<compile_context>
chip_gen: v7x
topology: tpu7x:2x2x1
jax: 0.10.0
libtpu: 0.0.40
codegen_flags: <defaults>
</compile_context>

<pallas_src>
import functools
import math

import jax
import jax.numpy as jnp
from jax import lax
from jax.experimental import pallas as pl
from jax.experimental.pallas import tpu as pltpu


# ----------------------------------------------------------------------------
# Kernel 1: fused Q/K/V projection. Single launch; concatenated weight stays
# resident in VMEM for all batches; three lane-contiguous outputs.
# ----------------------------------------------------------------------------
def _qkv_proj_kernel(DM, q_ref, k_ref, v_ref, w_ref, b_ref,
                     qo_ref, ko_ref, vo_ref):
    w = w_ref[...]                                  # (DIN, 3*DM), resident
    b = b_ref[...]                                  # (1, 3*DM)

    def proj(x_ref, off, o_ref):
        y = jnp.dot(x_ref[0], w[:, off:off + DM],
                    preferred_element_type=jnp.float32) + b[:, off:off + DM]
        o_ref[0] = y.astype(o_ref.dtype)

    # query/key/value may be different tensors, so three (S,DM)x(DM,DM) dots;
    # when they alias this could become one (S,DM)x(DM,3DM) wide-N GEMM.
    proj(q_ref, 0, qo_ref)
    proj(k_ref, DM, ko_ref)
    proj(v_ref, 2 * DM, vo_ref)


def fused_qkv_projection(query, key, value, w_qkv_t, b_qkv):
    B, S, DIN = query.shape
    DM = w_qkv_t.shape[1] // 3
    kernel = functools.partial(_qkv_proj_kernel, DM)
    return pl.pallas_call(
        kernel,
        out_shape=tuple(jax.ShapeDtypeStruct((B, S, DM), jnp.float32)
                        for _ in range(3)),
        grid=(B,),
        in_specs=[
            pl.BlockSpec((1, S, DIN), lambda b: (b, 0, 0)),
            pl.BlockSpec((1, S, DIN), lambda b: (b, 0, 0)),
            pl.BlockSpec((1, S, DIN), lambda b: (b, 0, 0)),
            pl.BlockSpec((DIN, 3 * DM), lambda b: (0, 0)),   # resident weight
            pl.BlockSpec((1, 3 * DM), lambda b: (0, 0)),
        ],
        out_specs=tuple(pl.BlockSpec((1, S, DM), lambda b: (b, 0, 0))
                        for _ in range(3)),
        compiler_params=pltpu.CompilerParams(dimension_semantics=("parallel",)),
    )(query, key, value, w_qkv_t, b_qkv.reshape(1, 3 * DM))


# ----------------------------------------------------------------------------
# Kernel 2: relation-aware attention with history gating + fused output
# projection. grid = (batch, key_tile); online softmax over key tiles.
# ----------------------------------------------------------------------------
def _attn_core_kernel(H, D, NSEP,
                      q_ref, k_ref, v_ref, rk_ref, rv_ref, mask_ref,
                      spd_ref, reg_ref, wo_ref, bo_ref,
                      o_ref,
                      m_sc, l_sc, acc_sc):
    kt = pl.program_id(1)
    scale = 1.0 / math.sqrt(D)

    @pl.when(kt == 0)
    def _init():
        m_sc[...] = jnp.full_like(m_sc, -jnp.inf)
        l_sc[...] = jnp.zeros_like(l_sc)
        acc_sc[...] = jnp.zeros_like(acc_sc)

    q_all = q_ref[0]                          # (S, H*D)   resident across k tiles
    k_all = k_ref[0]                          # (TK, H*D)
    v_all = v_ref[0]                          # (TK, H*D)
    rk = rk_ref[0]                            # (S, TK, D)
    rv = rv_ref[0]                            # (S, TK, D)
    is_masked = mask_ref[0] == 0.0            # (S, TK)
    spd = spd_ref[0]                          # (H, NSEP)  precomputed sep softmax
    reg = reg_ref[...]                        # (NSEP, S, TK) region masks

    for h in range(H):                        # H is static -> unrolled
        lo = h * D
        q_h = q_all[:, lo:lo + D]             # (S, D) lane slice
        k_h = k_all[:, lo:lo + D]             # (TK, D)
        v_h = v_all[:, lo:lo + D]             # (TK, D)

        # relation-aware logits: (q @ k^T + sum_d q[i,d]*rel_k[i,j,d]) / sqrt(D)
        qk = lax.dot_general(q_h, k_h, (((1,), (1,)), ((), ())),
                             preferred_element_type=jnp.float32)     # (S, TK)
        qr = jnp.sum(q_h[:, None, :] * rk, axis=-1)                  # (S, TK)
        s = (qk + qr) * scale
        s = jnp.where(is_masked, -1000000000.0, s)

        # History gating factor. NOTE: where factor == 0 (positions before the
        # first separator) masked -1e9 logits return to 0, exactly matching the
        # PyTorch module's `zeros` accumulation semantics.
        factor = spd[h:h + 1, 0:1] * reg[0]
        for n in range(1, NSEP):
            factor = factor + spd[h:h + 1, n:n + 1] * reg[n]
        s = s * factor

        # Online softmax over the key axis.
        m_prev = m_sc[:, h:h + 1]                                    # (S, 1)
        m_new = jnp.maximum(m_prev, jnp.max(s, axis=-1, keepdims=True))
        alpha = jnp.exp(m_prev - m_new)
        p = jnp.exp(s - m_new)                                       # (S, TK)
        l_sc[:, h:h + 1] = alpha * l_sc[:, h:h + 1] + jnp.sum(p, axis=-1,
                                                              keepdims=True)
        # TODO(synk): nn.Dropout(p=0.1) on p_attn omitted (eval-mode identity).

        # relation-aware values: p @ v + sum_j p[i,j]*rel_v[i,j,d]
        wv = jnp.dot(p, v_h, preferred_element_type=jnp.float32)     # (S, D)
        wtr = jnp.sum(p[:, :, None] * rv, axis=1)                    # (S, D)
        acc_sc[:, lo:lo + D] = alpha * acc_sc[:, lo:lo + D] + wv + wtr
        m_sc[:, h:h + 1] = m_new

    @pl.when(kt == pl.num_programs(1) - 1)
    def _finalize():
        # Normalize each head in the lane-dense accumulator, then fuse the
        # output projection so one lane-dense (S, H*D) block is written.
        for h in range(H):
            lo = h * D
            inv_l = pl.reciprocal(l_sc[:, h:h + 1], approx=True)
            acc_sc[:, lo:lo + D] = acc_sc[:, lo:lo + D] * inv_l
        x = acc_sc[...]                                              # (S, H*D)
        y = jnp.dot(x, wo_ref[...], preferred_element_type=jnp.float32) + bo_ref[...]
        o_ref[0] = y.astype(o_ref.dtype)


def attention_with_output_proj(q, k, v, rel_k, rel_v, mask, sep_pred, regions,
                               wo_t, bo, n_heads, *, k_tile=None):
    B, S, DM = q.shape
    H = n_heads
    D = DM // H
    NSEP = sep_pred.shape[-1]
    # For realistic S on v7x, pick k_tile (e.g. 128/256) so the (S, TK, D) rel
    # tiles double-buffer within VMEM; toy shapes use a single full tile.
    TK = S if k_tile is None else k_tile
    assert S % TK == 0
    KT = S // TK
    kernel = functools.partial(_attn_core_kernel, H, D, NSEP)
    return pl.pallas_call(
        kernel,
        out_shape=jax.ShapeDtypeStruct((B, S, DM), jnp.float32),
        grid=(B, KT),
        in_specs=[
            pl.BlockSpec((1, S, DM), lambda b, kt: (b, 0, 0)),         # q (resident)
            pl.BlockSpec((1, TK, DM), lambda b, kt: (b, kt, 0)),       # k tile
            pl.BlockSpec((1, TK, DM), lambda b, kt: (b, kt, 0)),       # v tile
            pl.BlockSpec((1, S, TK, D), lambda b, kt: (b, 0, kt, 0)),  # rel_k tile
            pl.BlockSpec((1, S, TK, D), lambda b, kt: (b, 0, kt, 0)),  # rel_v tile
            pl.BlockSpec((1, S, TK), lambda b, kt: (b, 0, kt)),        # mask tile
            pl.BlockSpec((1, H, NSEP), lambda b, kt: (b, 0, 0)),       # sep_pred
            pl.BlockSpec((NSEP, S, TK), lambda b, kt: (0, 0, kt)),     # region masks
            pl.BlockSpec((DM, DM), lambda b, kt: (0, 0)),              # W_o^T (resident)
            pl.BlockSpec((1, DM), lambda b, kt: (0, 0)),               # b_o
        ],
        out_specs=pl.BlockSpec((1, S, DM), lambda b, kt: (b, 0, 0)),
        scratch_shapes=[
            pltpu.VMEM((S, H), jnp.float32),    # running max per (row, head)
            pltpu.VMEM((S, H), jnp.float32),    # running sum per (row, head)
            pltpu.VMEM((S, DM), jnp.float32),   # lane-dense output accumulator
        ],
        compiler_params=pltpu.CompilerParams(
            dimension_semantics=("parallel", "arbitrary")),
    )(q, k, v, rel_k, rel_v, mask, sep_pred, regions, wo_t, bo.reshape(1, DM))


# ----------------------------------------------------------------------------
# Full module forward (glue in plain JAX; hot paths in the two kernels above)
# ----------------------------------------------------------------------------
def mha_history_relations_forward(params, query, key, value,
                                  relation_k, relation_v, mask,
                                  sep_id, history_reg, n_heads, *, k_tile=None):
    B, S, DM = query.shape
    H = n_heads
    D = DM // H
    NSEP = sep_id.shape[0]

    # Single-launch fused Q/K/V projection.
    w_qkv_t = jnp.concatenate(
        [params["wq"].T, params["wk"].T, params["wv"].T], axis=1)
    b_qkv = jnp.concatenate([params["bq"], params["bk"], params["bv"]], axis=0)
    q, k, v = fused_qkv_projection(query, key, value, w_qkv_t, b_qkv)

    # History gating softmax (tiny) hoisted out of the kernel.
    qs = q[:, sep_id, :].reshape(B, NSEP, H, D)
    pool = jnp.einsum("bnhd,hd->bhn", qs, params["hw"])
    sep_pred = jax.nn.softmax(pool, axis=-1)                  # (B, H, NSEP)

    # Region masks depend only on sep_id; computed once, shared by all (b, h).
    ii = jnp.arange(S)[:, None]
    jj = jnp.arange(S)[None, :]
    regions = jnp.stack(
        [((ii >= sep_id[n]) & (jj >= sep_id[n])).astype(jnp.float32)
         for n in range(NSEP)], axis=0)                       # (NSEP, S, S)

    # loss = mean(1 - ||sep_pred||_inf) + KL(log sep_pred || history_reg) (mean)
    loss = jnp.mean(1.0 - jnp.max(sep_pred, axis=-1))
    log_sp = jnp.log(sep_pred.reshape(-1, NSEP))
    tgt = jnp.broadcast_to(history_reg, log_sp.shape)
    loss = loss + jnp.mean(jnp.where(tgt > 0, tgt * (jnp.log(tgt) - log_sp), 0.0))

    out = attention_with_output_proj(q, k, v, relation_k, relation_v, mask,
                                     sep_pred, regions, params["wo"].T,
                                     params["bo"], H, k_tile=k_tile)
    return out, loss


# ----------------------------------------------------------------------------
# Pure-JAX reference (mirrors the PyTorch forward) for a sanity check
# ----------------------------------------------------------------------------
def reference_forward(params, query, key, value, rel_k, rel_v, mask,
                      sep_id, history_reg, n_heads):
    B, S, DM = query.shape
    H = n_heads
    D = DM // H
    NSEP = sep_id.shape[0]

    def lin(x, w, b):
        return x @ w.T + b

    q = lin(query, params["wq"], params["bq"]).reshape(B, S, H, D).transpose(0, 2, 1, 3)
    k = lin(key, params["wk"], params["bk"]).reshape(B, S, H, D).transpose(0, 2, 1, 3)
    v = lin(value, params["wv"], params["bv"]).reshape(B, S, H, D).transpose(0, 2, 1, 3)

    qk = jnp.einsum("bhqd,bhkd->bhqk", q, k)
    qr = jnp.einsum("bhqd,bqkd->bhqk", q, rel_k)
    scores = (qk + qr) / math.sqrt(D)
    scores = jnp.where(mask[:, None, :, :] == 0, -1000000000.0, scores)

    sep_sel = q[:, :, sep_id, :]
    pool = jnp.einsum("bhnd,hd->bhn", sep_sel, params["hw"])
    sep_pred = jax.nn.softmax(pool, axis=-1)

    ii = jnp.arange(S)[:, None]
    jj = jnp.arange(S)[None, :]
    factor = jnp.zeros((B, H, S, S), jnp.float32)
    for s in range(NSEP):
        region = ((ii >= sep_id[s]) & (jj >= sep_id[s])).astype(jnp.float32)
        factor = factor + sep_pred[:, :, s][:, :, None, None] * region[None, None]
    scores = scores * factor

    loss = jnp.mean(1.0 - jnp.max(sep_pred, axis=-1))
    log_sp = jnp.log(sep_pred.reshape(-1, NSEP))
    tgt = jnp.broadcast_to(history_reg, log_sp.shape)
    kl = jnp.mean(jnp.where(tgt > 0, tgt * (jnp.log(tgt) - log_sp), 0.0))
    loss = loss + kl

    p = jax.nn.softmax(scores, axis=-1)
    wv = jnp.einsum("bhqk,bhkd->bhqd", p, v)
    wtr = jnp.einsum("bhqk,bqkd->bhqd", p, rel_v)
    x = (wv + wtr).transpose(0, 2, 1, 3).reshape(B, S, DM)
    return lin(x, params["wo"], params["bo"]), loss


# ----------------------------------------------------------------------------
if __name__ == "__main__":
    B, S, H, DM = 2, 8, 4, 32
    D = DM // H
    NSEP = 2

    root = jax.random.PRNGKey(0)
    ks = jax.random.split(root, 16)

    bl = 1.0 / math.sqrt(DM)      # torch Linear default bound
    bh = 1.0 / math.sqrt(D)       # kaiming_uniform(a=sqrt(5)) bound for (H, D)
    params = {
        "wq": jax.random.uniform(ks[0], (DM, DM), jnp.float32, -bl, bl),
        "bq": jax.random.uniform(ks[1], (DM,), jnp.float32, -bl, bl),
        "wk": jax.random.uniform(ks[2], (DM, DM), jnp.float32, -bl, bl),
        "bk": jax.random.uniform(ks[3], (DM,), jnp.float32, -bl, bl),
        "wv": jax.random.uniform(ks[4], (DM, DM), jnp.float32, -bl, bl),
        "bv": jax.random.uniform(ks[5], (DM,), jnp.float32, -bl, bl),
        "wo": jax.random.uniform(ks[6], (DM, DM), jnp.float32, -bl, bl),
        "bo": jax.random.uniform(ks[7], (DM,), jnp.float32, -bl, bl),
        "hw": jax.random.uniform(ks[8], (H, D), jnp.float32, -bh, bh),
    }

    query = jax.random.normal(ks[9], (B, S, DM), jnp.float32)
    key_x = jax.random.normal(ks[10], (B, S, DM), jnp.float32)
    value = jax.random.normal(ks[11], (B, S, DM), jnp.float32)
    rel_k = jax.random.normal(ks[12], (B, S, S, D), jnp.float32)
    rel_v = jax.random.normal(ks[13], (B, S, S, D), jnp.float32)
    mask = jnp.ones((B, S, S), jnp.float32).at[:, :, S - 1].set(0.0)
    sep_id = jnp.array([0, 4], dtype=jnp.int32)
    history_reg = jnp.array([[0.6, 0.4]], dtype=jnp.float32)

    out, loss = mha_history_relations_forward(
        params, query, key_x, value, rel_k, rel_v, mask, sep_id, history_reg, H)
    out = jax.block_until_ready(out)
    loss = jax.block_until_ready(loss)

    ref_out, ref_loss = reference_forward(
        params, query, key_x, value, rel_k, rel_v, mask, sep_id, history_reg, H)
    assert out.shape == (B, S, DM)
    assert jnp.allclose(out, ref_out, atol=1e-2, rtol=1e-2), \
        float(jnp.max(jnp.abs(out - ref_out)))
    assert jnp.allclose(loss, ref_loss, atol=1e-3, rtol=1e-3), (float(loss), float(ref_loss))

    print("KERNEL_OK")
</pallas_src>

<mosaic_0001>
module attributes {stable_mosaic.version = 11 : i64} {
  func.func @_qkv_proj_kernel(%arg0: i32, %arg1: memref<1x8x32xf32, #tpu.memory_space<vmem>>, %arg2: memref<1x8x32xf32, #tpu.memory_space<vmem>>, %arg3: memref<1x8x32xf32, #tpu.memory_space<vmem>>, %arg4: memref<32x96xf32, #tpu.memory_space<vmem>>, %arg5: memref<1x96xf32, #tpu.memory_space<vmem>>, %arg6: memref<1x8x32xf32, #tpu.memory_space<vmem>>, %arg7: memref<1x8x32xf32, #tpu.memory_space<vmem>>, %arg8: memref<1x8x32xf32, #tpu.memory_space<vmem>>) attributes {dimension_semantics = [#tpu.dimension_semantics<parallel>], iteration_bounds = array<i64: 2>, scalar_prefetch = 0 : i64, scratch_operands = 0 : i64, tpu.core_type = #tpu.core_type<tc>, window_params = [{transform_indices = @transform_0, window_bounds = array<i64: 1, 8, 32>}, {transform_indices = @transform_1, window_bounds = array<i64: 1, 8, 32>}, {transform_indices = @transform_2, window_bounds = array<i64: 1, 8, 32>}, {pipeline_mode = #tpu.pipeline_mode<synchronous>, transform_indices = @transform_3, window_bounds = array<i64: 32, 96>}, {pipeline_mode = #tpu.pipeline_mode<synchronous>, transform_indices = @transform_4, window_bounds = array<i64: 1, 96>}, {transform_indices = @transform_5, window_bounds = array<i64: 1, 8, 32>}, {transform_indices = @transform_6, window_bounds = array<i64: 1, 8, 32>}, {transform_indices = @transform_7, window_bounds = array<i64: 1, 8, 32>}]} {
    %c0 = arith.constant 0 : index
    %c0_0 = arith.constant 0 : index
    %0 = vector.load %arg4[%c0, %c0_0] : memref<32x96xf32, #tpu.memory_space<vmem>>, vector<32x96xf32>
    %c0_1 = arith.constant 0 : index
    %c0_2 = arith.constant 0 : index
    %1 = vector.load %arg5[%c0_1, %c0_2] : memref<1x96xf32, #tpu.memory_space<vmem>>, vector<1x96xf32>
    %c0_3 = arith.constant 0 : index
    %c0_4 = arith.constant 0 : index
    %c0_5 = arith.constant 0 : index
    %2 = vector.load %arg1[%c0_3, %c0_4, %c0_5] : memref<1x8x32xf32, #tpu.memory_space<vmem>>, vector<1x8x32xf32>
    %3 = vector.shape_cast %2 : vector<1x8x32xf32> to vector<8x32xf32>
    %4 = vector.extract_strided_slice %0 {offsets = [0, 0], sizes = [32, 32], strides = [1, 1]} : vector<32x96xf32> to vector<32x32xf32>
    %cst = arith.constant dense<0.000000e+00> : vector<8x32xf32>
    %5 = tpu.matmul %3, %4, %cst {dimension_numbers = #tpu.dot_dimension_numbers<[1], [0], [0], [1], [0, 0, 1, 1], [], []>} : vector<8x32xf32>, vector<32x32xf32>, vector<8x32xf32> -> vector<8x32xf32>
    %6 = vector.extract_strided_slice %1 {offsets = [0, 0], sizes = [1, 32], strides = [1, 1]} : vector<1x96xf32> to vector<1x32xf32>
    %7 = vector.broadcast %6 : vector<1x32xf32> to vector<8x32xf32>
    %8 = arith.addf %5, %7 : vector<8x32xf32>
    %c0_6 = arith.constant 0 : index
    %c0_7 = arith.constant 0 : index
    %c0_8 = arith.constant 0 : index
    %9 = vector.load %arg6[%c0_6, %c0_7, %c0_8] : memref<1x8x32xf32, #tpu.memory_space<vmem>>, vector<1x8x32xf32>
    %10 = vector.shape_cast %9 : vector<1x8x32xf32> to vector<8x32xf32>
    %11 = vector.shape_cast %8 : vector<8x32xf32> to vector<1x8x32xf32>
    tpu.vector_store %arg6[%c0_6, %c0_7, %c0_8], %11 {strides = array<i32>} : memref<1x8x32xf32, #tpu.memory_space<vmem>>, vector<1x8x32xf32>,
    %c0_9 = arith.constant 0 : index
    %c0_10 = arith.constant 0 : index
    %c0_11 = arith.constant 0 : index
    %12 = vector.load %arg2[%c0_9, %c0_10, %c0_11] : memref<1x8x32xf32, #tpu.memory_space<vmem>>, vector<1x8x32xf32>
    %13 = vector.shape_cast %12 : vector<1x8x32xf32> to vector<8x32xf32>
    %14 = vector.extract_strided_slice %0 {offsets = [0, 32], sizes = [32, 32], strides = [1, 1]} : vector<32x96xf32> to vector<32x32xf32>
    %cst_12 = arith.constant dense<0.000000e+00> : vector<8x32xf32>
    %15 = tpu.matmul %13, %14, %cst_12 {dimension_numbers = #tpu.dot_dimension_numbers<[1], [0], [0], [1], [0, 0, 1, 1], [], []>} : vector<8x32xf32>, vector<32x32xf32>, vector<8x32xf32> -> vector<8x32xf32>
    %16 = vector.extract_strided_slice %1 {offsets = [0, 32], sizes = [1, 32], strides = [1, 1]} : vector<1x96xf32> to vector<1x32xf32>
    %17 = vector.broadcast %16 : vector<1x32xf32> to vector<8x32xf32>
    %18 = arith.addf %15, %17 : vector<8x32xf32>
    %c0_13 = arith.constant 0 : index
    %c0_14 = arith.constant 0 : index
    %c0_15 = arith.constant 0 : index
    %19 = vector.load %arg7[%c0_13, %c0_14, %c0_15] : memref<1x8x32xf32, #tpu.memory_space<vmem>>, vector<1x8x32xf32>
    %20 = vector.shape_cast %19 : vector<1x8x32xf32> to vector<8x32xf32>
    %21 = vector.shape_cast %18 : vector<8x32xf32> to vector<1x8x32xf32>
    tpu.vector_store %arg7[%c0_13, %c0_14, %c0_15], %21 {strides = array<i32>} : memref<1x8x32xf32, #tpu.memory_space<vmem>>, vector<1x8x32xf32>,
    %c0_16 = arith.constant 0 : index
    %c0_17 = arith.constant 0 : index
    %c0_18 = arith.constant 0 : index
    %22 = vector.load %arg3[%c0_16, %c0_17, %c0_18] : memref<1x8x32xf32, #tpu.memory_space<vmem>>, vector<1x8x32xf32>
    %23 = vector.shape_cast %22 : vector<1x8x32xf32> to vector<8x32xf32>
    %24 = vector.extract_strided_slice %0 {offsets = [0, 64], sizes = [32, 32], strides = [1, 1]} : vector<32x96xf32> to vector<32x32xf32>
    %cst_19 = arith.constant dense<0.000000e+00> : vector<8x32xf32>
    %25 = tpu.matmul %23, %24, %cst_19 {dimension_numbers = #tpu.dot_dimension_numbers<[1], [0], [0], [1], [0, 0, 1, 1], [], []>} : vector<8x32xf32>, vector<32x32xf32>, vector<8x32xf32> -> vector<8x32xf32>
    %26 = vector.extract_strided_slice %1 {offsets = [0, 64], sizes = [1, 32], strides = [1, 1]} : vector<1x96xf32> to vector<1x32xf32>
    %27 = vector.broadcast %26 : vector<1x32xf32> to vector<8x32xf32>
    %28 = arith.addf %25, %27 : vector<8x32xf32>
    %c0_20 = arith.constant 0 : index
    %c0_21 = arith.constant 0 : index
    %c0_22 = arith.constant 0 : index
    %29 = vector.load %arg8[%c0_20, %c0_21, %c0_22] : memref<1x8x32xf32, #tpu.memory_space<vmem>>, vector<1x8x32xf32>
    %30 = vector.shape_cast %29 : vector<1x8x32xf32> to vector<8x32xf32>
    %31 = vector.shape_cast %28 : vector<8x32xf32> to vector<1x8x32xf32>
    tpu.vector_store %arg8[%c0_20, %c0_21, %c0_22], %31 {strides = array<i32>} : memref<1x8x32xf32, #tpu.memory_space<vmem>>, vector<1x8x32xf32>,
    return
  }
  func.func @transform_0(%arg0: i32) -> (i32, i32, i32) {
    %c0_i32 = arith.constant 0 : i32
    %c0_i32_0 = arith.constant 0 : i32
    %c0_i32_1 = arith.constant 0 : i32
    return %arg0, %c0_i32, %c0_i32_0 : i32, i32, i32
  }
  func.func @transform_1(%arg0: i32) -> (i32, i32, i32) {
    %c0_i32 = arith.constant 0 : i32
    %c0_i32_0 = arith.constant 0 : i32
    %c0_i32_1 = arith.constant 0 : i32
    return %arg0, %c0_i32, %c0_i32_0 : i32, i32, i32
  }
  func.func @transform_2(%arg0: i32) -> (i32, i32, i32) {
    %c0_i32 = arith.constant 0 : i32
    %c0_i32_0 = arith.constant 0 : i32
    %c0_i32_1 = arith.constant 0 : i32
    return %arg0, %c0_i32, %c0_i32_0 : i32, i32, i32
  }
  func.func @transform_3(%arg0: i32) -> (i32, i32) {
    %c0_i32 = arith.constant 0 : i32
    %c0_i32_0 = arith.constant 0 : i32
    %c0_i32_1 = arith.constant 0 : i32
    return %c0_i32, %c0_i32_0 : i32, i32
  }
  func.func @transform_4(%arg0: i32) -> (i32, i32) {
    %c0_i32 = arith.constant 0 : i32
    %c0_i32_0 = arith.constant 0 : i32
    %c0_i32_1 = arith.constant 0 : i32
    return %c0_i32, %c0_i32_0 : i32, i32
  }
  func.func @transform_5(%arg0: i32) -> (i32, i32, i32) {
    %c0_i32 = arith.constant 0 : i32
    %c0_i32_0 = arith.constant 0 : i32
    %c0_i32_1 = arith.constant 0 : i32
    return %arg0, %c0_i32, %c0_i32_0 : i32, i32, i32
  }
  func.func @transform_6(%arg0: i32) -> (i32, i32, i32) {
    %c0_i32 = arith.constant 0 : i32
    %c0_i32_0 = arith.constant 0 : i32
    %c0_i32_1 = arith.constant 0 : i32
    return %arg0, %c0_i32, %c0_i32_0 : i32, i32, i32
  }
  func.func @transform_7(%arg0: i32) -> (i32, i32, i32) {
    %c0_i32 = arith.constant 0 : i32
    %c0_i32_0 = arith.constant 0 : i32
    %c0_i32_1 = arith.constant 0 : i32
    return %arg0, %c0_i32, %c0_i32_0 : i32, i32, i32
  }
}

</mosaic_0001>

<bundles_post_ra>
// kernel: tpu_custom_call.1
= control target key start
LH: loop header
LB: loop body
LE: loop exit
PB: predicated region body
PF: predicated region fallthrough
CT: control target
= control target key end

     0   :  { %s1787_s0 = inlined_call_operand.hbm [shape: f32[2,8,32], index: 0, kind: input, shape index: {}]   ;;  %s1788_s1 = inlined_call_operand.hbm [shape: f32[2,8,32], index: 1, kind: input, shape index: {}]   ;;  %s1789_s2 = inlined_call_operand.hbm [shape: f32[2,8,32], index: 2, kind: input, shape index: {}]   ;;  %s1790_s3 = inlined_call_operand.hbm [shape: f32[32,96], index: 3, kind: input, shape index: {}]   ;;  %s1791_s4 = inlined_call_operand.vmem [shape: f32[1,96], index: 4, kind: input, shape index: {}]   ;;  %s1792_s5 = inlined_call_operand.hbm [shape: f32[2,8,32], index: 5, kind: output, shape index: {0}]   ;;  %s1793_s6 = inlined_call_operand.hbm [shape: f32[2,8,32], index: 6, kind: output, shape index: {1}]   ;;  %s1794_s7 = inlined_call_operand.hbm [shape: f32[2,8,32], index: 7, kind: output, shape index: {2}]  }
   0x1   :  { %1815 = sst [smem:[#allocation24_spill]] %s1788_s1 }
   0x2   :  { %1816 = sst [smem:[#allocation25_spill]] %s1792_s5 }
   0x3   :  { %1817 = sst [smem:[#allocation26_spill]] %s1793_s6 }
   0x4   :  { %1818 = sst [smem:[#allocation27_spill]] %s1794_s7 }
   0x5   :  { %13 = vsyncpa [#allocation3], 0 }
   0x6   :  { %15 = vsyncpa [#allocation3 + $0x1], 0 }
   0x7   :  { %16 = vsyncpa [#allocation6], 0 }
   0x8   :  { %18 = vsyncpa [#allocation6 + $0x1], 0 }
   0x9   :  { %19 = vsyncpa [#allocation9], 0 }
   0xa   :  { %20 = vsyncpa [#allocation4], 0 }
   0xb   :  { %22 = vsyncpa [#allocation4 + $0x1], 0 }
   0xc   :  { %23 = vsyncpa [#allocation12], 0 }
   0xd   :  { %25 = vsyncpa [#allocation12 + $0x1], 0  ;;  %s1411_s24 = smov 0   ;;  %s1413_s25 = smov 0  }
   0xe   :  { %s1415_s26 = smov 0   ;;  %s1417_s27 = smov 0  }
   0xf LB: > { %1819 = sst [smem:[#allocation19_spill]] %s1343_s24  ;;  %s1432_s28 = sadd.s32 1, %s1355_s27   ;;  %s1355_s27 = sphi %s1417_s27, %s1852_s27   ;;  %s1351_s26 = sphi %s1415_s26, %s1856_s26   ;;  %s1347_s25 = sphi %s1413_s25, %s1855_s25   ;;  %s1343_s24 = sphi %s1411_s24, %s1854_s24  }
  0x10   : > { %1820 = sst [smem:[#allocation20_spill]] %s1355_s27  ;;  %s38_s29 = sadd.s32 1, %s1351_s26 }
  0x11   : > { %1821 = sst [smem:[#allocation21_spill]] %s1432_s28  ;;  %s35_s30 = ssub.s32 %s1355_s27, %s1432_s28 }
  0x12   : > { %p1795_p0 = scmp.ne.s32.totalorder %s1351_s26, %s1347_s25  ;;  %p36_p1 = scmp.eq.s32.totalorder %s35_s30, 0 }
  0x13   : > { %p46_p2 = scmp.eq.s32.totalorder %s1355_s27, 0  ;;  %p1040_p4 = scmp.lt.s32.totalorder %s1355_s27, 2 }
  0x14   : > { %s1443_s8 = scalar_select %p36_p1, %s1351_s26, %s38_s29  }
  0x15   : > { %p47_p5 = por %p46_p2, %p1795_p0  ;;  %s1797_s9 = sand.u32 1, %s1351_s26  }
  0x16   : > { %1822 = sst [smem:[#allocation22_spill]] %s1443_s8  ;;  %s1451_s10 = sshll.u32 %s1797_s9, 3 }
  0x17   : > { %s1454_s11 = sshll.u32 %s1355_s27, 7  ;;  %p1456_p6 = pnand %p1040_p4, %p47_p5 }
  0x18   : > { %s281_s13 = sand.u32 1, %s1355_s27   ;;  %s1824_s1 = sld [smem:[#allocation24_spill]] }
  0x19   : > { %s1823_s12 = scalar_select %p1456_p6, 1, 0 }
  0x1a   : > { %s285_s17 = scalar_lea.vmem [#allocation5], %s1451_s10  ;;  %s1470_s19 = scalar_lea.sflag [#allocation6], %s281_s13 }
  0x1b   : > { %s292_s18 = sshll.u32 %s285_s17, 4  ;;  %p1476_p8 = pneg %p1456_p6  ;;  %s1468_s18 = int_to_ptr.vmem [resolvable:$true] %s292_s18 }
  0x1d   : > { %s1825_s21 = scalar_select %p1476_p8, 1, 0 }
  0x1e   : > { %s1465_s16 = scalar_lea.hbm %s1824_s1, %s1454_s11  ;;  %s1108_s29 = scalar_lea.hbm %s1824_s1, 256 }
  0x1f   : > { %s1103_s20 = scalar_lea.hbm %s1465_s16, 128  ;;  %p1109_p11 = scmp.lt.u32.totalorder %s1465_s16, %s1824_s1 }
  0x20   : > { %p1104_p7 = scmp.ne.s32.totalorder %s1465_s16, %s1103_s20  ;;  %p1110_p12 = scmp.lt.u32.totalorder %s1108_s29, %s1103_s20 }
  0x21   : > { %p1112_p1 = scmp.lt.u32.totalorder %s1103_s20, %s1465_s16 }
  0x22   : > { %p1106_p9 = pnand %p1476_p8, %p1104_p7  ;;  %p1111_p13 = por %p1110_p12, %p1109_p11 }
  0x24   : > { %p1107_p10 = pneg %p1106_p9  ;;  %p1113_p2 = por %p1112_p1, %p1111_p13 }
  0x26   : > { %p1114_p4 = pnand %p1113_p2, %p1107_p10 }
  0x28   : > { %1117 = shalt.err (!%p1114_p4)
}
  0x29   : > { %s1118_s13 = scalar_lea.vmem %s1468_s18, 128  ;;  %s1357_s15 = smov [#allocation5]  }
  0x2a   : > { %p1119_p5 = scmp.ne.s32.totalorder %s1468_s18, %s1118_s13  ;;  %s1123_s17 = sshll.u32 %s1357_s15, 4  ;;  %s1124_s17 = int_to_ptr.vmem [resolvable:$false] %s1123_s17 }
  0x2b   : > { %s1125_s22 = scalar_lea.vmem %s1124_s17, 256  ;;  %p1126_p3 = scmp.lt.s32.totalorder %s1468_s18, %s1124_s17 }
  0x2c   : > { %p1121_p7 = pnand %p1119_p5, %p1476_p8  ;;  %p1127_p0 = scmp.lt.s32.totalorder %s1125_s22, %s1118_s13 }
  0x2e   : > { %p1122_p9 = pneg %p1121_p7  ;;  %p1128_p11 = por %p1127_p0, %p1126_p3 }
  0x30   : > { %p1129_p12 = pnand %p1128_p11, %p1122_p9 }
  0x32   : > { %1132 = shalt.err (!%p1129_p12)
}
  0x33   : > { %1025 = dma.hbm_to_vmem [thread:$0]  (!%p1456_p6), %s1465_s16, 128, %s1468_s18, %s1470_s19  }
  0x34   : > { %s1501_s20 = sadd.s32 4294967295, %s1355_s27   ;;  %s1796_s23 = sadd.s32 4294967294, %s1355_s27  }
  0x35   : > { %p51_p0 = scmp.ne.s32.totalorder %s1347_s25, %s1343_s24  ;;  %p1805_p3 = scmp.eq.s32.totalorder %s1501_s20, 0 }
  0x36   : > { %p169_p10 = scmp.eq.s32.totalorder %s1501_s20, 1  ;;  %p175_p13 = scmp.eq.s32.totalorder %s1796_s23, 1 }
  0x37   : > { %p1512_p1 = por %p1805_p3, %p51_p0  ;;  %p904_p2 = scmp.ge.s32.totalorder %s1355_s27, 1 }
  0x38   : > { %p1827_p4 = scmp.ne.s32.totalorder %s1351_s26, %s1347_s25  ;;  %p1524_p7 = por %p175_p13, %p51_p0 }
  0x39   : > { %s1826_s29 = scalar_select %p1512_p1, 1, 0 }
  0x3a   : > { %p1520_p5 = por %p169_p10, %p1827_p4  ;;  %p234_p9 = scmp.lt.s32.totalorder %s1355_s27, 3 }
  0x3b   : > { %s1829_s18 = scalar_select %p1524_p7, 1, 0 }
  0x3c   : > { %s1828_s16 = scalar_select %p1520_p5, 1, 0 }
  0x3d   : > { %1830 = sst [smem:[#allocation23_spill]] %s1829_s18  ;;  %p1529_p11 = pnand %p904_p2, %p234_p9 }
  0x3e   : > { %s1358_s14 = smov [#allocation8]   ;;  %s1541_s22 = scalar_lea.hbm %s1787_s0, %s1454_s11 }
  0x3f   : > { %s1831_s30 = scalar_select %p1529_p11, 1, 0 }
  0x40   : > { %s246_s13 = sshll.u32 %s1358_s14, 4  ;;  %p1015_p12 = pneg %p1529_p11  ;;  %s1533_s13 = int_to_ptr.vmem [resolvable:$true] %s246_s13 }
  0x41   : > { %s267_s9 = scalar_lea.vmem [#allocation2], %s1451_s10  ;;  %s1556_s28 = scalar_lea.hbm %s1789_s2, %s1454_s11 }
  0x42   : > { %p1545_p0 = pnand %p1015_p12, %p1805_p3  ;;  %s274_s1 = sshll.u32 %s267_s9, 4  ;;  %s1550_s1 = int_to_ptr.vmem [resolvable:$true] %s274_s1 }
  0x43   : > { %s1133_s15 = scalar_lea.hbm %s1790_s3, 512 }
  0x44   : > { %p1134_p10 = scmp.ne.s32.totalorder %s1790_s3, %s1133_s15  ;;  %p1135_p13 = pneg %p1545_p0 }
  0x45   : > { %p1140_p9 = scmp.lt.u32.totalorder %s1133_s15, %s1790_s3 }
  0x46   : > { %p1136_p2 = pnand %p1135_p13, %p1134_p10 }
  0x48   : > { %p1137_p4 = pneg %p1136_p2 }
  0x4a   : > { %p1142_p12 = pnand %p1140_p9, %p1137_p4 }
  0x4c   : > { %1145 = shalt.err (!%p1142_p12)
}
  0x4d   : > { %s1146_s8 = scalar_lea.vmem %s1533_s13, 512  ;;  %p1154_p1 = scmp.lt.s32.totalorder %s1533_s13, %s1533_s13 }
  0x4e   : > { %p1147_p3 = scmp.ne.s32.totalorder %s1533_s13, %s1146_s8  ;;  %p1155_p11 = scmp.lt.s32.totalorder %s1146_s8, %s1146_s8 }
  0x50   : > { %p1149_p7 = pnand %p1147_p3, %p1135_p13  ;;  %p1156_p6 = por %p1155_p11, %p1154_p1 }
  0x52   : > { %p1150_p5 = pneg %p1149_p7 }
  0x54   : > { %p1157_p8 = pnand %p1156_p6, %p1150_p5 }
  0x56   : > { %1160 = shalt.err (!%p1157_p8)
}
  0x57   : > { %s1359_s24 = smov 128   ;;  %s1360_s7 = smov 8  }
  0x58   : > { %1018 = dma.hbm_to_vmem [thread:$0]  (!%p1545_p0), %s1790_s3, 512, %s1533_s13, [#allocation9], %s1359_s24, %s1359_s24, %s1360_s7  }
  0x59   : > { %s1833_s18 = sand.u32 1, %s1351_s26   ;;  %s1161_s15 = scalar_lea.hbm %s1541_s22, 128 }
  0x5a   : > { %s264_s14 = scalar_lea.sflag [#allocation3], %s1833_s18  ;;  %p1162_p6 = scmp.ne.s32.totalorder %s1541_s22, %s1161_s15 }
  0x5b   : > { %p1834_p8 = scmp.ne.s32.totalorder %s1825_s21, 0  ;;  %s1166_s8 = scalar_lea.hbm %s1787_s0, 256 }
  0x5c   : > { %p1167_p5 = scmp.lt.u32.totalorder %s1541_s22, %s1787_s0  ;;  %p1168_p7 = scmp.lt.u32.totalorder %s1166_s8, %s1161_s15 }
  0x5d   : > { %p1164_p3 = pnand %p1162_p6, %p1834_p8  ;;  %p1170_p10 = scmp.lt.u32.totalorder %s1161_s15, %s1541_s22 }
  0x5e   : > { %p1169_p11 = por %p1168_p7, %p1167_p5 }
  0x5f   : > { %p1165_p1 = pneg %p1164_p3 }
  0x60   : > { %p1171_p13 = por %p1170_p10, %p1169_p11 }
  0x62   : > { %p1172_p0 = pnand %p1171_p13, %p1165_p1 }
  0x64   : > { %1175 = shalt.err (!%p1172_p0)
}
  0x65   : > { %s1176_s23 = scalar_lea.vmem %s1550_s1, 128  ;;  %s1361_s13 = smov [#allocation2]  }
  0x66   : > { %p1177_p2 = scmp.ne.s32.totalorder %s1550_s1, %s1176_s23  ;;  %s1181_s24 = sshll.u32 %s1361_s13, 4  ;;  %s1182_s24 = int_to_ptr.vmem [resolvable:$false] %s1181_s24 }
  0x67   : > { %s1183_s5 = scalar_lea.vmem %s1182_s24, 256  ;;  %p1184_p12 = scmp.lt.s32.totalorder %s1550_s1, %s1182_s24 }
  0x68   : > { %p1179_p4 = pnand %p1177_p2, %p1834_p8  ;;  %p1185_p6 = scmp.lt.s32.totalorder %s1183_s5, %s1176_s23 }
  0x6a   : > { %p1180_p9 = pneg %p1179_p4  ;;  %p1186_p3 = por %p1185_p6, %p1184_p12 }
  0x6c   : > { %p1187_p5 = pnand %p1186_p3, %p1180_p9 }
  0x6e   : > { %1190 = shalt.err (!%p1187_p5)
}
  0x6f   : > { %p1835_p1 = scmp.ne.s32.totalorder %s1823_s12, 0  ;;  %s303_s6 = scalar_lea.vmem [#allocation7], %s1451_s10 }
  0x70   : > { %s310_s7 = sshll.u32 %s303_s6, 4  ;;  %s1191_s27 = scalar_lea.hbm %s1556_s28, 128  ;;  %s311_s7 = int_to_ptr.vmem [resolvable:$true] %s310_s7 }
  0x71   : > { %1022 = dma.hbm_to_vmem [thread:$0]  (!%p1835_p1), %s1541_s22, 128, %s1550_s1, %s264_s14  }
  0x72   : > { %p1192_p7 = scmp.ne.s32.totalorder %s1556_s28, %s1191_s27  ;;  %s1196_s15 = scalar_lea.hbm %s1789_s2, 256 }
  0x73   : > { %p1197_p13 = scmp.lt.u32.totalorder %s1556_s28, %s1789_s2  ;;  %p1198_p0 = scmp.lt.u32.totalorder %s1196_s15, %s1191_s27 }
  0x74   : > { %p1194_p11 = pnand %p1192_p7, %p1834_p8  ;;  %p1200_p4 = scmp.lt.u32.totalorder %s1191_s27, %s1556_s28 }
  0x75   : > { %p1199_p2 = por %p1198_p0, %p1197_p13 }
  0x76   : > { %p1195_p10 = pneg %p1194_p11 }
  0x77   : > { %p1201_p9 = por %p1200_p4, %p1199_p2 }
  0x79   : > { %p1202_p12 = pnand %p1201_p9, %p1195_p10 }
  0x7b   : > { %1205 = shalt.err (!%p1202_p12)
}
  0x7c   : > { %s1206_s1 = scalar_lea.vmem %s311_s7, 128  ;;  %s1362_s10 = smov [#allocation7]  }
  0x7d   : > { %p1207_p6 = scmp.ne.s32.totalorder %s311_s7, %s1206_s1  ;;  %s1211_s22 = sshll.u32 %s1362_s10, 4  ;;  %s1212_s22 = int_to_ptr.vmem [resolvable:$false] %s1211_s22 }
  0x7e   : > { %s1213_s14 = scalar_lea.vmem %s1212_s22, 256  ;;  %p1214_p7 = scmp.lt.s32.totalorder %s311_s7, %s1212_s22 }
  0x7f   : > { %p1209_p3 = pnand %p1207_p6, %p1834_p8  ;;  %p1215_p11 = scmp.lt.s32.totalorder %s1213_s14, %s1206_s1 }
  0x81   : > { %p1210_p5 = pneg %p1209_p3  ;;  %p1216_p1 = por %p1215_p11, %p1214_p7 }
  0x83   : > { %p1217_p0 = pnand %p1216_p1, %p1210_p5 }
  0x85   : > { %1220 = shalt.err (!%p1217_p0)
}
  0x86   : > { %p1836_p13 = scmp.ne.s32.totalorder %s1823_s12, 0  ;;  %p1837_p10 = scmp.ne.s32.totalorder %s1831_s30, 0 }
  0x87   : > { %s1624_s21 = sand.u32 (!%p1837_p10), 1, %s1347_s25   ;;  %p1838_p8 = scmp.ne.s32.totalorder (!%p1837_p10), %s1826_s29, 0 }
  0x88   : > { %1028 = dma.hbm_to_vmem [thread:$0]  (!%p1836_p13), %s1556_s28, 128, %s311_s7, %s1470_s19  }
  0x89   : > { %319 = sbr.rel (%p1837_p10) target bundleno = 533 (0x215), region = 40  ;;  %s1627_s8 = sshll.u32 (!%p1837_p10), %s1624_s21, 3 }
  0x8a   : > { %s322_s23 = scalar_lea.sflag (!%p1837_p10), [#allocation3], %s1624_s21  ;;  %s325_s13 = scalar_lea.vmem (!%p1837_p10), [#allocation2], %s1627_s8 }
  0x90   : > { %1322 = dma.done.wait (%p1838_p8), %s322_s23, 128  }
  0x91   : > { %1324 = vsyncadd (%p1838_p8), %s322_s23, 4294967168  ;;  %s330_s28 = sand.u32 1, %s1501_s20   ;;  %s334_s19 = scalar_lea.vmem [#allocation5], %s1627_s8 }
  0x92   : > { %s331_s12 = scalar_lea.sflag [#allocation6], %s330_s28 }
  0x93   : > { %1326 = dma.done.wait (%p1838_p8), %s331_s12, 256  }
  0x94   : > { %1328 = vsyncadd (%p1838_p8), %s331_s12, 4294967040  ;;  %s343_s30 = scalar_lea.vmem [#allocation7], %s1627_s8  ;;  %p1839_p1 = scmp.eq.s32.totalorder %s1501_s20, 0 }
  0x96   : > { %1330 = dma.done.wait (%p1839_p1), [#allocation9], 512   ;;  %p1840_p2 = pmov %p1839_p1 }
  0x97   : > { %v1363_v0 = vmov 0.0|0.0   ;;  %vm1364_vm0 = vmmov 0   ;;  %v1365_v1 = vmov 0.0   ;;  %v398_v2 = vld [vmem:[#allocation8] sm:$0xff]  ;;  %v399_v3 = vld [vmem:[#allocation8 + $0x8] sm:$0xff]  ;;  %v400_v4 = vld [vmem:[#allocation8 + $0x10] sm:$0xff] }
  0x98   : > { %1332 = vsyncadd (%p1840_p2), [#allocation9], 4294966784  ;;  %981 = vmatprep.subr.bf16.mxu0 %v1363_v0  ;;  %987 = vmatprep.subr.bf16.mxu1 %v1363_v0  ;;  %v1083_v5 = vpack.i.bf16 %v399_v3, %v398_v2  ;;  %v401_v6 = vld [vmem:[#allocation8 + $0x18] sm:$0xff]  ;;  %v982_v7 = vpack.c.bf16 %v399_v3, %v398_v2  ;;  %s1366_s29 = smov 96   ;;  %s1367_s24 = smov 64   ;;  %vm410_vm1 = vcmask 261120  }
  0x99   : > { %956 = vmatprep.mubr.msk.f32.mxu0 %vm1364_vm0, %v1365_v1  ;;  %967 = vmatprep.mubr.msk.f32.mxu1 %vm1364_vm0, %v1365_v1  ;;  %v1093_v8 = vpack.i.bf16 %v401_v6, %v400_v4  ;;  %v985_v9 = vpack.c.bf16 %v401_v6, %v400_v4  ;;  %v403_v10 = vld [vmem:[%s325_s13] sm:$0xff]  ;;  %v485_v28 = vld [vmem:[%s334_s19] sm:$0xff]  ;;  %s1664_s7 = sshll.u32 %s1501_s20, 7  ;;  %s383_s27 = scalar_lea.vmem [#allocation10], %s1627_s8 }
  0x9a   : > { %1084 = vrot.lane.b32.xlu0 %v1083_v5, %s1366_s29  ;;  %983 = vmatpush3.bf16.msra.mxu0 %v982_v7  ;;  %v921_v11 = vld [vmem:[%s1791_s4] ss:$0 sm:$0xff]  ;;  %s693_s11 = sshll.u32 %s383_s27, 4  ;;  %s1841_s17 = sld [smem:[#allocation25_spill]]  ;;  %s1673_s11 = int_to_ptr.vmem [resolvable:$true] %s693_s11 }
  0x9b   : > { %1094 = vrot.lane.b32.xlu1 %v1093_v8, %s1366_s29  ;;  %984 = vmatprep.subr.bf16.mxu0 %v1363_v0  ;;  %v579_v29 = vld [vmem:[%s343_s30] sm:$0xff]  ;;  %s670_s1 = scalar_lea.sflag [#allocation4], %s1624_s21  ;;  %s1221_s10 = scalar_lea.vmem %s1673_s11, 128 }
  0x9c   : > { %p1222_p4 = scmp.ne.s32.totalorder %s1673_s11, %s1221_s10  ;;  %p1842_p9 = scmp.ne.s32.totalorder %s1828_s16, 0 }
  0x9d   : > { %s1368_s22 = smov [#allocation10]  }
  0x9e   : > { %1089 = vrot.lane.b32.xlu0 %v1083_v5, %s1367_s24  ;;  %986 = vmatpush3.bf16.msra.mxu0 %v985_v9  ;;  %p1223_p12 = pnand %p1222_p4, %p1842_p9  ;;  %s1225_s14 = sshll.u32 %s1368_s22, 4  ;;  %s1226_s14 = int_to_ptr.vmem [resolvable:$false] %s1225_s14 }
  0x9f   : > { %1099 = vrot.lane.b32.xlu1 %v1093_v8, %s1367_s24  ;;  %993 = vmatprep.subr.bf16.mxu0 %v1363_v0  ;;  %s1227_s23 = scalar_lea.vmem %s1226_s14, 256  ;;  %p1228_p3 = scmp.lt.s32.totalorder %s1673_s11, %s1226_s14 }
  0xa0   : > { %s1671_s9 = scalar_lea.hbm %s1841_s17, %s1664_s7  ;;  %p1224_p6 = pneg %p1223_p12 }
  0xa1   : > { %957 = vmatmul.mubr.msk.f32.vlgmr.msra.gmra.mrb[0].mxu0 %vm410_vm1, %v403_v10  ;;  %p1229_p5 = scmp.lt.s32.totalorder %s1227_s23, %s1221_s10 }
  0xa2   : > { %978 = vmatprep.mubr.msk.f32.mxu0 %vm1364_vm0, %v1365_v1  ;;  %502 = vrot.lane.b32.xlu0 %v921_v11, %s1366_s29 }
  0xa3   : > { %592 = vrot.lane.b32.xlu1 %v921_v11, %s1367_s24  ;;  %p1230_p7 = por %p1229_p5, %p1228_p3 }
  0xa5   : > { %p1231_p11 = pnand %p1230_p7, %p1224_p6 }
 0x10c   : > { %v1085_v12 = vpop.permute.xlu0 %1084 }
 0x10d   : > { %v1087_v13 = vunpack.i.h.bf16 %v1085_v12  ;;  %v1086_v14 = vunpack.i.l.bf16 %v1085_v12  ;;  %v1095_v15 = vpop.permute.xlu1 %1094 }
 0x10e   : > { %v1097_v16 = vunpack.i.h.bf16 %v1095_v15  ;;  %v1096_v17 = vunpack.i.l.bf16 %v1095_v15 }
 0x10f   : > { %v988_v18 = vpack.c.bf16 %v1087_v13, %v1086_v14 }
 0x110   : > { %v1090_v19 = vpop.permute.xlu0 %1089  ;;  %v991_v20 = vpack.c.bf16 %v1097_v16, %v1096_v17 }
 0x111   : > { %v1092_v21 = vunpack.i.h.bf16 %v1090_v19  ;;  %v1091_v22 = vunpack.i.l.bf16 %v1090_v19  ;;  %989 = vmatpush3.bf16.msra.mxu1 %v988_v18  ;;  %v1100_v23 = vpop.permute.xlu1 %1099 }
 0x112   : > { %v1102_v24 = vunpack.i.h.bf16 %v1100_v23  ;;  %v1101_v25 = vunpack.i.l.bf16 %v1100_v23  ;;  %990 = vmatprep.subr.bf16.mxu1 %v1363_v0 }
 0x113   : > { %v994_v26 = vpack.c.bf16 %v1092_v21, %v1091_v22 }
 0x114   : > { %v997_v27 = vpack.c.bf16 %v1102_v24, %v1101_v25 }
 0x115   : > { %992 = vmatpush3.bf16.msra.mxu1 %v991_v20  ;;  %995 = vmatpush3.bf16.msra.mxu0 %v994_v26 }
 0x116   : > { %996 = vmatprep.subr.bf16.mxu0 %v1363_v0 }
 0x118   : > { %968 = vmatmul.mubr.msk.f32.vlgmr.msra.gmra.mrb[0].mxu1 %vm410_vm1, %v485_v28 }
 0x119   : > { %998 = vmatpush3.bf16.msra.mxu0 %v997_v27 }
 0x11c   : > { %979 = vmatmul.mubr.msk.f32.vlgmr.msra.gmra.mrb[2].mxu0 %vm410_vm1, %v579_v29 }
 0x174   : > { %v480_v30 = vpop.f32.mrb[0].mxu0 }
 0x175   : > { %v481_v31 = vadd.f32 %v921_v11, %v480_v30  ;;  %v958_v32 = vpop.f32.mrb[1].mxu0 }
 0x177   : > { %484 = vst.msk [vmem:[%s383_s27] sm:$0xff] %vm410_vm1, %v481_v31 }
 0x178   : > { %1234 = shalt.err (!%p1231_p11)
}
 0x179   : > { %s1235_s21 = scalar_lea.hbm %s1671_s9, 128  ;;  %s1239_s19 = scalar_lea.hbm %s1841_s17, 256 }
 0x17a   : > { %p1236_p0 = scmp.ne.s32.totalorder %s1671_s9, %s1235_s21  ;;  %p1240_p8 = scmp.lt.u32.totalorder %s1671_s9, %s1841_s17 }
 0x17b   : > { %p1241_p1 = scmp.lt.u32.totalorder %s1239_s19, %s1235_s21  ;;  %p1243_p4 = scmp.lt.u32.totalorder %s1235_s21, %s1671_s9 }
 0x17c   : > { %p1237_p13 = pnand %p1236_p0, %p1842_p9 }
 0x17d   : > { %p1242_p2 = por %p1241_p1, %p1240_p8 }
 0x17e   : > { %p1238_p10 = pneg %p1237_p13 }
 0x17f   : > { %p1244_p12 = por %p1243_p4, %p1242_p2 }
 0x181   : > { %p1245_p6 = pnand %p1244_p12, %p1238_p10 }
 0x183   : > { %1248 = shalt.err (!%p1245_p6)
}
 0x184   : > { %1009 = dma.vmem_to_hbm [thread:$0]  (%p1842_p9), %s1673_s11, 128, %s1671_s9, %s670_s1   ;;  %v503_v33 = vpop.permute.xlu0 %502  ;;  %v593_v37 = vpop.permute.xlu1 %592 }
 0x185   : > { %s390_s24 = scalar_lea.vmem [#allocation11], %s1627_s8  ;;  %s1843_s18 = sld [smem:[#allocation26_spill]] }
 0x186   : > { %s706_s5 = sshll.u32 %s390_s24, 4  ;;  %s397_s10 = scalar_lea.vmem [#allocation13], %s1627_s8  ;;  %s1705_s5 = int_to_ptr.vmem [resolvable:$true] %s706_s5 }
 0x187   : > { %s1710_s11 = sshll.u32 %s397_s10, 4  ;;  %s1715_s9 = scalar_lea.sflag [#allocation12], %s330_s28  ;;  %s720_s11 = int_to_ptr.vmem [resolvable:$true] %s1710_s11 }
 0x188   : > { %s1249_s1 = scalar_lea.vmem %s1705_s5, 128  ;;  %s1369_s22 = smov [#allocation11]  }
 0x189   : > { %p1250_p3 = scmp.ne.s32.totalorder %s1705_s5, %s1249_s1  ;;  %s1253_s14 = sshll.u32 %s1369_s22, 4  ;;  %s1254_s14 = int_to_ptr.vmem [resolvable:$false] %s1253_s14 }
 0x18a   : > { %s1255_s23 = scalar_lea.vmem %s1254_s14, 256  ;;  %p1256_p11 = scmp.lt.s32.totalorder %s1705_s5, %s1254_s14 }
 0x18b   : > { %s1703_s15 = scalar_lea.hbm %s1843_s18, %s1664_s7  ;;  %p1251_p5 = pnand %p1250_p3, %p1842_p9 }
 0x18c   : > { %p1257_p0 = scmp.lt.s32.totalorder %s1255_s23, %s1249_s1 }
 0x18d   : > { %p1252_p7 = pneg %p1251_p5 }
 0x18e   : > { %p1258_p13 = por %p1257_p0, %p1256_p11 }
 0x190   : > { %p1259_p10 = pnand %p1258_p13, %p1252_p7 }
 0x1eb   : > { %v574_v34 = vpop.f32.mrb[0].mxu1 }
 0x1ec   : > { %v575_v35 = vadd.f32 %v574_v34, %v503_v33  ;;  %v969_v36 = vpop.f32.mrb[1].mxu1 }
 0x1ee   : > { %578 = vst.msk [vmem:[%s390_s24] sm:$0xff] %vm410_vm1, %v575_v35 }
 0x1ef   : > { %v664_v38 = vpop.f32.mrb[2].mxu0 }
 0x1f0   : > { %1262 = shalt.err (!%p1259_p10)
}
 0x1f1   : > { %s1263_s20 = scalar_lea.hbm %s1703_s15, 128  ;;  %s1267_s13 = scalar_lea.hbm %s1843_s18, 256 }
 0x1f2   : > { %p1264_p8 = scmp.ne.s32.totalorder %s1703_s15, %s1263_s20  ;;  %p1268_p4 = scmp.lt.u32.totalorder %s1703_s15, %s1843_s18 }
 0x1f3   : > { %p1269_p12 = scmp.lt.u32.totalorder %s1267_s13, %s1263_s20  ;;  %p1271_p3 = scmp.lt.u32.totalorder %s1263_s20, %s1703_s15 }
 0x1f4   : > { %p1265_p1 = pnand %p1264_p8, %p1842_p9 }
 0x1f5   : > { %p1270_p6 = por %p1269_p12, %p1268_p4 }
 0x1f6   : > { %p1266_p2 = pneg %p1265_p1 }
 0x1f7   : > { %p1272_p5 = por %p1271_p3, %p1270_p6 }
 0x1f9   : > { %p1273_p7 = pnand %p1272_p5, %p1266_p2 }
 0x1fb   : > { %1276 = shalt.err (!%p1273_p7)
}
 0x1fc   : > { %1010 = dma.vmem_to_hbm [thread:$0]  (%p1842_p9), %s1705_s5, 128, %s1703_s15, %s1715_s9   ;;  %v665_v39 = vadd.f32 %v664_v38, %v593_v37  ;;  %v980_v40 = vpop.f32.mrb[3].mxu0 }
 0x1fd   : > { %s1844_s24 = sld [smem:[#allocation27_spill]]  ;;  %s1277_s1 = scalar_lea.vmem %s720_s11, 128 }
 0x1fe   : > { %668 = vst.msk [vmem:[%s397_s10] sm:$0xff] %vm410_vm1, %v665_v39  ;;  %p1278_p11 = scmp.ne.s32.totalorder %s720_s11, %s1277_s1  ;;  %s1370_s22 = smov [#allocation13]  }
 0x1ff   : > { %s1281_s14 = sshll.u32 %s1370_s22, 4  ;;  %s1282_s14 = int_to_ptr.vmem [resolvable:$false] %s1281_s14 }
 0x200   : > { %p1279_p0 = pnand %p1278_p11, %p1842_p9  ;;  %s1283_s5 = scalar_lea.vmem %s1282_s14, 256 }
 0x201   : > { %p1284_p10 = scmp.lt.s32.totalorder %s720_s11, %s1282_s14  ;;  %p1285_p8 = scmp.lt.s32.totalorder %s1283_s5, %s1277_s1 }
 0x202   : > { %p1280_p13 = pneg %p1279_p0 }
 0x203   : > { %s1845_s6 = smov %s1844_s24  ;;  %s1743_s27 = scalar_lea.hbm %s1844_s24, %s1664_s7 }
 0x204   : > { %p1286_p1 = por %p1285_p8, %p1284_p10 }
 0x206   : > { %p1287_p2 = pnand %p1286_p1, %p1280_p13 }
 0x208   : > { %1290 = shalt.err (!%p1287_p2)
}
 0x209   : > { %s1291_s8 = scalar_lea.hbm %s1743_s27, 128  ;;  %s1295_s10 = scalar_lea.hbm %s1845_s6, 256 }
 0x20a   : > { %p1292_p4 = scmp.ne.s32.totalorder %s1743_s27, %s1291_s8  ;;  %p1296_p3 = scmp.lt.u32.totalorder %s1743_s27, %s1845_s6 }
 0x20b   : > { %p1297_p5 = scmp.lt.u32.totalorder %s1295_s10, %s1291_s8  ;;  %p1299_p11 = scmp.lt.u32.totalorder %s1291_s8, %s1743_s27 }
 0x20c   : > { %p1293_p12 = pnand %p1292_p4, %p1842_p9 }
 0x20d   : > { %p1298_p7 = por %p1297_p5, %p1296_p3 }
 0x20e   : > { %p1294_p6 = pneg %p1293_p12 }
 0x20f   : > { %p1300_p0 = por %p1299_p11, %p1298_p7 }
 0x211   : > { %p1301_p13 = pnand %p1300_p0, %p1294_p6 }
 0x213   : > { %1304 = shalt.err (!%p1301_p13)
}
 0x214   : > { %1011 = dma.vmem_to_hbm [thread:$0]  (%p1842_p9), %s720_s11, 128, %s1743_s27, %s1715_s9  }
 0x215 PF: > { %s1846_s28 = sld [smem:[#allocation19_spill]]  ;;  %s1847_s21 = sld [smem:[#allocation23_spill]] }
 0x216   : > { %s1848_s13 = sld [smem:[#allocation20_spill]] }
 0x21b   : > { %s731_s12 = sand.u32 1, %s1846_s28   ;;  %p1849_p10 = scmp.ne.s32.totalorder %s1847_s21, 0 }
 0x21c   : > { %p1850_p8 = scmp.ge.s32.totalorder %s1848_s13, 2  ;;  %s732_s19 = scalar_lea.sflag [#allocation4], %s731_s12 }
 0x21e   : > { %p1030_p1 = pnand %p1850_p8, %p1849_p10 }
 0x220   : > { %1334 = dma.done.wait (!%p1030_p1), %s732_s19, 128  }
 0x221   : > { %1336 = vsyncadd (!%p1030_p1), %s732_s19, 4294967168  ;;  %s1851_s30 = sadd.s32 4294967294, %s1848_s13  }
 0x222   : > { %s740_s29 = sand.u32 1, %s1851_s30  }
 0x223   : > { %s741_s24 = scalar_lea.sflag [#allocation12], %s740_s29 }
 0x224   : > { %1338 = dma.done.wait (!%p1030_p1), %s741_s24, 256  }
 0x225   : > { %1340 = vsyncadd (!%p1030_p1), %s741_s24, 4294967040  ;;  %s1852_s27 = sld [smem:[#allocation21_spill]]  ;;  %s1853_s16 = sld [smem:[#allocation22_spill]] }
 0x226   : > { %s1854_s24 = smov %s1347_s25  ;;  %s1855_s25 = smov %s1351_s26 }
 0x22b   : > { %p28_p9 = scmp.ge.s32.totalorder %s1852_s27, 4   ;;  %s1856_s26 = smov %s1853_s16 }
 0x22d   :  { %30 = sbr.rel (!%p28_p9) target bundleno = 15 (0xf), region = 145 }
 0x234   :  { %755 = vsyncpa [#allocation3], 1 }
 0x235   :  { %757 = vsyncpa [#allocation3 + $0x1], 1 }
 0x236   :  { %758 = vsyncpa [#allocation6], 1 }
 0x237   :  { %760 = vsyncpa [#allocation6 + $0x1], 1 }
 0x238   :  { %761 = vsyncpa [#allocation9], 1 }
 0x239   :  { %762 = vsyncpa [#allocation4], 1 }
 0x23a   :  { %764 = vsyncpa [#allocation4 + $0x1], 1 }
 0x23b   :  { %765 = vsyncpa [#allocation12], 1 }
 0x23c   :  { %767 = vsyncpa [#allocation12 + $0x1], 1 }

</bundles_post_ra>
